<compile_context>
chip_gen: v5e
topology: v5e:2x2
jax: 0.10.0
libtpu: 0.0.40
codegen_flags: <defaults>
</compile_context>

<pallas_src>
import math
import functools

import jax
import jax.numpy as jnp
from jax.experimental import pallas as pl
from jax.experimental.pallas import tpu as pltpu


def _mha_kernel(num_heads, causal, has_pad, scale, *refs):
    if has_pad:
        (q_ref, k_ref, v_ref, qbias_ref, kbias_ref,
         w_qkv_ref, b_qkv_ref, wo_ref, bo_ref, out_ref) = refs
    else:
        (q_ref, k_ref, v_ref,
         w_qkv_ref, b_qkv_ref, wo_ref, bo_ref, out_ref) = refs

    cdt = q_ref.dtype                    # compute dtype (f32 or bf16)
    tq, D = q_ref.shape
    Sk = k_ref.shape[0]
    dh = D // num_heads

    # ---- Full-width, lane-dense projections (MXU N = D), f32 accumulation.
    # 1/sqrt(dh) is folded into the Q projection result (fuses with bias add).
    qp = ((jnp.dot(q_ref[...], w_qkv_ref[0], preferred_element_type=jnp.float32)
           + b_qkv_ref[0]) * scale).astype(cdt)
    kp = (jnp.dot(k_ref[...], w_qkv_ref[1], preferred_element_type=jnp.float32)
          + b_qkv_ref[1]).astype(cdt)
    vp = (jnp.dot(v_ref[...], w_qkv_ref[2], preferred_element_type=jnp.float32)
          + b_qkv_ref[2]).astype(cdt)

    # ---- Mask pieces shared by all heads (built in-kernel, O(tq*Sk) VPU work).
    if has_pad:
        add_bias = qbias_ref[...] + kbias_ref[...]        # (tq,1)+(1,Sk)->(tq,Sk)
    if causal:
        qt = pl.program_id(1)
        row = jax.lax.broadcasted_iota(jnp.int32, (tq, Sk), 0) + qt * tq
        col = jax.lax.broadcasted_iota(jnp.int32, (tq, Sk), 1)
        causal_ok = row >= col

    # ---- Per-head attention (static lane slices; softmax in f32).
    ctx_parts = []
    for h in range(num_heads):
        lo = h * dh
        qh = qp[:, lo:lo + dh]
        kh = kp[:, lo:lo + dh]
        vh = vp[:, lo:lo + dh]

        logits = jnp.einsum("qd,kd->qk", qh, kh,
                            preferred_element_type=jnp.float32)      # (tq, Sk)
        if has_pad:
            logits = logits + add_bias
        if causal:
            logits = jnp.where(causal_ok, logits, jnp.float32(-1e9))

        logits = logits - jnp.max(logits, axis=-1, keepdims=True)
        p = jnp.exp(logits)
        p = p * pl.reciprocal(jnp.sum(p, axis=-1, keepdims=True), approx=True)

        ctx_parts.append(jnp.dot(p.astype(cdt), vh,
                                 preferred_element_type=jnp.float32))

    ctx = jnp.concatenate(ctx_parts, axis=-1).astype(cdt)            # (tq, D)

    # ---- Single deferred output projection (lane-dense K = D contraction).
    out = (jnp.dot(ctx, wo_ref[...], preferred_element_type=jnp.float32)
           + bo_ref[...].astype(jnp.float32))
    out_ref[...] = out.astype(out_ref.dtype)


def multihead_attention(query, key, value, params, num_heads,
                        query_ids=None, key_ids=None, causal=False,
                        pad_idx=1, compute_dtype=jnp.float32, q_tile=256):
    """query: (B, Sq, D); key/value: (B, Sk, D).

    params = (wq, bq, wk, bk, wv, bv, wo, bo); weights stored as (in, out),
    biases as (1, out), matching the PyTorch module after transpose.

    Masking mirrors the module: padding masks are derived from the token id
    tensors (`query_ids`/`key_ids`, pad positions == pad_idx) and `causal=True`
    adds the look-ahead mask. The (Sq, Sk) mask is never materialized in HBM;
    only O(B*S) additive pad vectors are passed to the kernel.
    """
    B, Sq, D = query.shape
    _, Sk, _ = key.shape
    H = num_heads
    dh = D // H
    assert D == H * dh
    out_dtype = query.dtype

    wq, bq, wk, bk, wv, bv, wo, bo = params
    w_qkv = jnp.stack([wq, wk, wv], axis=0)        # (3, D, D), original layout
    b_qkv = jnp.stack([bq, bk, bv], axis=0)        # (3, 1, D)
    bo2 = bo.reshape(1, D)

    cdt = compute_dtype
    q, k, v = (x.astype(cdt) for x in (query, key, value))
    w_qkv, b_qkv, wo_c, bo2 = (x.astype(cdt) for x in (w_qkv, b_qkv, wo, bo2))

    # Q-sequence tiling: bounds the live logits block to (tq, Sk) and gives the
    # grid a second parallel axis (both TensorCores busy on v7x even at B == 1).
    tq = Sq if Sq <= q_tile else q_tile
    if Sq % tq != 0 or (tq != Sq and tq % 8 != 0):
        tq = Sq
    nqt = Sq // tq

    has_pad = (query_ids is not None) or (key_ids is not None)

    in_specs = [
        pl.BlockSpec((None, tq, D), lambda b, t: (b, t, 0)),   # q tile
        pl.BlockSpec((None, Sk, D), lambda b, t: (b, 0, 0)),   # k (per batch)
        pl.BlockSpec((None, Sk, D), lambda b, t: (b, 0, 0)),   # v (per batch)
    ]
    args = [q, k, v]

    if has_pad:
        if query_ids is not None:
            q_bias = jnp.where(query_ids == pad_idx, -1e9, 0.0)
        else:
            q_bias = jnp.zeros((B, Sq))
        if key_ids is not None:
            k_bias = jnp.where(key_ids == pad_idx, -1e9, 0.0)
        else:
            k_bias = jnp.zeros((B, Sk))
        q_bias = q_bias.astype(jnp.float32).reshape(B, Sq, 1)
        k_bias = k_bias.astype(jnp.float32).reshape(B, 1, Sk)
        in_specs += [
            pl.BlockSpec((None, tq, 1), lambda b, t: (b, t, 0)),
            pl.BlockSpec((None, 1, Sk), lambda b, t: (b, 0, 0)),
        ]
        args += [q_bias, k_bias]

    # Weights / biases: constant index_map -> DMA'd once, resident across grid.
    in_specs += [
        pl.BlockSpec((3, D, D), lambda b, t: (0, 0, 0)),
        pl.BlockSpec((3, 1, D), lambda b, t: (0, 0, 0)),
        pl.BlockSpec((D, D), lambda b, t: (0, 0)),
        pl.BlockSpec((1, D), lambda b, t: (0, 0)),
    ]
    args += [w_qkv, b_qkv, wo_c, bo2]

    scale = 1.0 / math.sqrt(dh)
    kernel = functools.partial(_mha_kernel, H, causal, has_pad, scale)

    itemsize = jnp.dtype(cdt).itemsize
    out_itemsize = jnp.dtype(out_dtype).itemsize

    # Cost estimate (true traffic: weights once, output included).
    flops = (2 * B * Sq * D * D                       # Q projection
             + 2 * 2 * B * nqt * Sk * D * D           # K, V projections
             + 4 * B * Sq * Sk * D                    # QK^T and PV
             + 2 * B * Sq * D * D)                    # output projection
    bytes_accessed = (itemsize * (B * Sq * D + 2 * B * Sk * D)
                      + out_itemsize * B * Sq * D
                      + itemsize * (4 * D * D + 4 * D))
    if has_pad:
        bytes_accessed += 4 * B * (Sq + Sk)
    cost = pl.CostEstimate(flops=int(flops),
                           transcendentals=int(B * H * Sq * Sk),
                           bytes_accessed=int(bytes_accessed))

    # VMEM budget from the actual footprint (double-buffered blocks + resident
    # weights + headroom for in-kernel logits spills), clamped to v7x's 64 MiB.
    block_bytes = itemsize * (tq * D + 2 * Sk * D) + out_itemsize * tq * D
    if has_pad:
        block_bytes += 4 * (tq + Sk)
    weight_bytes = itemsize * (3 * D * D + 3 * D + D * D + D)
    vmem_bytes = 2 * block_bytes + 2 * weight_bytes + 8 * tq * Sk * 4 + (2 << 20)
    vmem_limit = int(min(max(vmem_bytes, 16 << 20), 64 << 20))

    return pl.pallas_call(
        kernel,
        out_shape=jax.ShapeDtypeStruct((B, Sq, D), out_dtype),
        grid_spec=pltpu.PrefetchScalarGridSpec(
            num_scalar_prefetch=0,
            grid=(B, nqt),
            in_specs=in_specs,
            out_specs=pl.BlockSpec((None, tq, D), lambda b, t: (b, t, 0)),
        ),
        compiler_params=pltpu.CompilerParams(
            dimension_semantics=("parallel", "parallel"),
            vmem_limit_bytes=vmem_limit,
        ),
        cost_estimate=cost,
    )(*args)


# ----------------------------------------------------------------------------
# Mask construction mirroring Transformer.create_padding_mask / _lookahead_mask
# (used for the reference only; the kernel builds its mask in-kernel).
# ----------------------------------------------------------------------------
def create_padding_mask(query_ids, key_ids, pad_idx=1):
    qm = (query_ids != pad_idx)[:, None, :, None]    # (B, 1, Sq, 1)
    km = (key_ids != pad_idx)[:, None, None, :]      # (B, 1, 1, Sk)
    return (qm & km).astype(jnp.int32)                # (B, 1, Sq, Sk)


def create_lookahead_mask(q_len, k_len):
    return jnp.tril(jnp.ones((q_len, k_len), jnp.int32))


# ----------------------------------------------------------------------------
# Pure-JAX reference mirroring the PyTorch module exactly.
# ----------------------------------------------------------------------------
def reference_mha(query, key, value, params, num_heads, mask=None):
    B, Sq, D = query.shape
    _, Sk, _ = key.shape
    dh = D // num_heads
    wq, bq, wk, bk, wv, bv, wo, bo = params

    def proj(x, w, b, S):
        y = x @ w + b
        y = y.reshape(B, S, num_heads, dh)
        return jnp.transpose(y, (0, 2, 1, 3))         # (B, H, S, dh)

    Q = proj(query, wq, bq, Sq)
    K = proj(key, wk, bk, Sk)
    V = proj(value, wv, bv, Sk)
    logits = jnp.einsum("bhqd,bhkd->bhqk", Q, K) / math.sqrt(dh)
    if mask is not None:
        logits = jnp.where(mask == 0, -1e9, logits)
    attn = jax.nn.softmax(logits, axis=-1)
    out = jnp.einsum("bhqk,bhkd->bhqd", attn, V)
    out = jnp.transpose(out, (0, 2, 1, 3)).reshape(B, Sq, D)
    return out @ wo + bo


if __name__ == "__main__":
    B, S, SE, D, H = 2, 8, 16, 32, 4       # dec len 8, enc len 16, hidden 32
    PAD = 1

    key0 = jax.random.PRNGKey(0)
    keys = jax.random.split(key0, 20)

    q = jax.random.normal(keys[0], (B, S, D), jnp.float32)
    k = jax.random.normal(keys[1], (B, S, D), jnp.float32)
    v = jax.random.normal(keys[2], (B, S, D), jnp.float32)
    k_enc = jax.random.normal(keys[12], (B, SE, D), jnp.float32)
    v_enc = jax.random.normal(keys[13], (B, SE, D), jnp.float32)

    # nn.Linear-style init; stored transposed as (in, out), biases (1, out).
    def linear_params(kw, kb, fan_in, fan_out):
        bound = 1.0 / math.sqrt(fan_in)
        w = jax.random.uniform(kw, (fan_in, fan_out), jnp.float32, -bound, bound)
        b = jax.random.uniform(kb, (1, fan_out), jnp.float32, -bound, bound)
        return w, b

    wq, bq = linear_params(keys[3], keys[4], D, D)
    wk, bk = linear_params(keys[5], keys[6], D, D)
    wv, bv = linear_params(keys[7], keys[8], D, D)
    wo, bo = linear_params(keys[9], keys[10], D, D)
    params = (wq, bq, wk, bk, wv, bv, wo, bo)

    # Token ids with trailing padding, like the Transformer's inputs.
    dec_ids = jax.random.randint(keys[11], (B, S), 2, 50, dtype=jnp.int32)
    dec_ids = dec_ids.at[0, -2:].set(PAD).at[1, -3:].set(PAD)
    enc_ids = jax.random.randint(keys[14], (B, SE), 2, 50, dtype=jnp.int32)
    enc_ids = enc_ids.at[0, -4:].set(PAD).at[1, -1:].set(PAD)

    # Fully-padded query rows have an all-zero mask row; their attention output
    # is ill-defined (the module softmaxes a row of -1e9s), so compare only the
    # valid (non-pad) query positions for masked paths.
    valid_q = (dec_ids != PAD).astype(jnp.float32)[:, :, None]   # (B, S, 1)

    # --- Decoder self-attention: look-ahead & padding (Transformer.forward).
    self_mask = (create_lookahead_mask(S, S)[None, None]
                 & create_padding_mask(dec_ids, dec_ids, PAD))   # (B, 1, S, S)
    out_self = multihead_attention(q, k, v, params, H,
                                   query_ids=dec_ids, key_ids=dec_ids,
                                   causal=True, pad_idx=PAD)
    jax.block_until_ready(out_self)
    ref_self = reference_mha(q, k, v, params, H, mask=self_mask)
    err_self = jnp.max(jnp.abs((out_self - ref_self) * valid_q))
    assert err_self < 2e-3, float(err_self)

    # --- Decoder->encoder cross-attention: padding mask only (dec_mask).
    cross_mask = create_padding_mask(dec_ids, enc_ids, PAD)      # (B, 1, S, SE)
    out_cross = multihead_attention(q, k_enc, v_enc, params, H,
                                    query_ids=dec_ids, key_ids=enc_ids,
                                    causal=False, pad_idx=PAD)
    jax.block_until_ready(out_cross)
    ref_cross = reference_mha(q, k_enc, v_enc, params, H, mask=cross_mask)
    err_cross = jnp.max(jnp.abs((out_cross - ref_cross) * valid_q))
    assert err_cross < 2e-3, float(err_cross)

    # --- No mask.
    out_nomask = multihead_attention(q, k, v, params, H)
    jax.block_until_ready(out_nomask)
    ref_nomask = reference_mha(q, k, v, params, H, mask=None)
    err_nomask = jnp.max(jnp.abs(out_nomask - ref_nomask))
    assert err_nomask < 2e-3, float(err_nomask)

    # --- bf16 compute path (f32 MXU accumulation) — looser tolerance.
    out_bf16 = multihead_attention(q, k, v, params, H,
                                   query_ids=dec_ids, key_ids=dec_ids,
                                   causal=True, pad_idx=PAD,
                                   compute_dtype=jnp.bfloat16)
    jax.block_until_ready(out_bf16)
    err_bf16 = jnp.max(jnp.abs((out_bf16.astype(jnp.float32) - ref_self) * valid_q))
    assert err_bf16 < 1e-1, float(err_bf16)

    print("KERNEL_OK")
</pallas_src>

<mosaic_0001>
module attributes {stable_mosaic.version = 11 : i64} {
  func.func @_mha_kernel(%arg0: i32, %arg1: i32, %arg2: memref<1x8x32xf32, #tpu.memory_space<vmem>>, %arg3: memref<1x8x32xf32, #tpu.memory_space<vmem>>, %arg4: memref<1x8x32xf32, #tpu.memory_space<vmem>>, %arg5: memref<1x8x1xf32, #tpu.memory_space<vmem>>, %arg6: memref<1x1x8xf32, #tpu.memory_space<vmem>>, %arg7: memref<3x32x32xf32, #tpu.memory_space<vmem>>, %arg8: memref<3x1x32xf32, #tpu.memory_space<vmem>>, %arg9: memref<32x32xf32, #tpu.memory_space<vmem>>, %arg10: memref<1x32xf32, #tpu.memory_space<vmem>>, %arg11: memref<1x8x32xf32, #tpu.memory_space<vmem>>) attributes {dimension_semantics = [#tpu.dimension_semantics<parallel>, #tpu.dimension_semantics<parallel>], iteration_bounds = array<i64: 2, 1>, scalar_prefetch = 0 : i64, scratch_operands = 0 : i64, tpu.core_type = #tpu.core_type<tc>, window_params = [{transform_indices = @transform_0, window_bounds = array<i64: 1, 8, 32>}, {transform_indices = @transform_1, window_bounds = array<i64: 1, 8, 32>}, {transform_indices = @transform_2, window_bounds = array<i64: 1, 8, 32>}, {transform_indices = @transform_3, window_bounds = array<i64: 1, 8, 1>}, {transform_indices = @transform_4, window_bounds = array<i64: 1, 1, 8>}, {pipeline_mode = #tpu.pipeline_mode<synchronous>, transform_indices = @transform_5, window_bounds = array<i64: 3, 32, 32>}, {pipeline_mode = #tpu.pipeline_mode<synchronous>, transform_indices = @transform_6, window_bounds = array<i64: 3, 1, 32>}, {pipeline_mode = #tpu.pipeline_mode<synchronous>, transform_indices = @transform_7, window_bounds = array<i64: 32, 32>}, {pipeline_mode = #tpu.pipeline_mode<synchronous>, transform_indices = @transform_8, window_bounds = array<i64: 1, 32>}, {transform_indices = @transform_9, window_bounds = array<i64: 1, 8, 32>}]} {
    %c0 = arith.constant 0 : index
    %c0_0 = arith.constant 0 : index
    %c0_1 = arith.constant 0 : index
    %0 = vector.load %arg2[%c0, %c0_0, %c0_1] : memref<1x8x32xf32, #tpu.memory_space<vmem>>, vector<1x8x32xf32>
    %1 = vector.shape_cast %0 : vector<1x8x32xf32> to vector<8x32xf32>
    %c0_2 = arith.constant 0 : index
    %c0_3 = arith.constant 0 : index
    %c0_4 = arith.constant 0 : index
    %2 = vector.load %arg7[%c0_2, %c0_3, %c0_4] : memref<3x32x32xf32, #tpu.memory_space<vmem>>, vector<1x32x32xf32>
    %3 = vector.shape_cast %2 : vector<1x32x32xf32> to vector<32x32xf32>
    %cst = arith.constant dense<0.000000e+00> : vector<8x32xf32>
    %4 = tpu.matmul %1, %3, %cst {dimension_numbers = #tpu.dot_dimension_numbers<[1], [0], [0], [1], [0, 0, 1, 1], [], []>} : vector<8x32xf32>, vector<32x32xf32>, vector<8x32xf32> -> vector<8x32xf32>
    %c0_5 = arith.constant 0 : index
    %c0_6 = arith.constant 0 : index
    %c0_7 = arith.constant 0 : index
    %5 = vector.load %arg8[%c0_5, %c0_6, %c0_7] : memref<3x1x32xf32, #tpu.memory_space<vmem>>, vector<1x1x32xf32>
    %6 = vector.shape_cast %5 : vector<1x1x32xf32> to vector<1x32xf32>
    %7 = vector.broadcast %6 : vector<1x32xf32> to vector<8x32xf32>
    %8 = arith.addf %4, %7 : vector<8x32xf32>
    %cst_8 = arith.constant 0.353553385 : f32
    %9 = vector.broadcast %cst_8 : f32 to vector<8x32xf32>
    %10 = arith.mulf %8, %9 : vector<8x32xf32>
    %c0_9 = arith.constant 0 : index
    %c0_10 = arith.constant 0 : index
    %c0_11 = arith.constant 0 : index
    %11 = vector.load %arg3[%c0_9, %c0_10, %c0_11] : memref<1x8x32xf32, #tpu.memory_space<vmem>>, vector<1x8x32xf32>
    %12 = vector.shape_cast %11 : vector<1x8x32xf32> to vector<8x32xf32>
    %c1 = arith.constant 1 : index
    %c0_12 = arith.constant 0 : index
    %c0_13 = arith.constant 0 : index
    %13 = vector.load %arg7[%c1, %c0_12, %c0_13] : memref<3x32x32xf32, #tpu.memory_space<vmem>>, vector<1x32x32xf32>
    %14 = vector.shape_cast %13 : vector<1x32x32xf32> to vector<32x32xf32>
    %cst_14 = arith.constant dense<0.000000e+00> : vector<8x32xf32>
    %15 = tpu.matmul %12, %14, %cst_14 {dimension_numbers = #tpu.dot_dimension_numbers<[1], [0], [0], [1], [0, 0, 1, 1], [], []>} : vector<8x32xf32>, vector<32x32xf32>, vector<8x32xf32> -> vector<8x32xf32>
    %c1_15 = arith.constant 1 : index
    %c0_16 = arith.constant 0 : index
    %c0_17 = arith.constant 0 : index
    %16 = vector.load %arg8[%c1_15, %c0_16, %c0_17] : memref<3x1x32xf32, #tpu.memory_space<vmem>>, vector<1x1x32xf32>
    %17 = vector.shape_cast %16 : vector<1x1x32xf32> to vector<1x32xf32>
    %18 = vector.broadcast %17 : vector<1x32xf32> to vector<8x32xf32>
    %19 = arith.addf %15, %18 : vector<8x32xf32>
    %c0_18 = arith.constant 0 : index
    %c0_19 = arith.constant 0 : index
    %c0_20 = arith.constant 0 : index
    %20 = vector.load %arg4[%c0_18, %c0_19, %c0_20] : memref<1x8x32xf32, #tpu.memory_space<vmem>>, vector<1x8x32xf32>
    %21 = vector.shape_cast %20 : vector<1x8x32xf32> to vector<8x32xf32>
    %c2 = arith.constant 2 : index
    %c0_21 = arith.constant 0 : index
    %c0_22 = arith.constant 0 : index
    %22 = vector.load %arg7[%c2, %c0_21, %c0_22] : memref<3x32x32xf32, #tpu.memory_space<vmem>>, vector<1x32x32xf32>
    %23 = vector.shape_cast %22 : vector<1x32x32xf32> to vector<32x32xf32>
    %cst_23 = arith.constant dense<0.000000e+00> : vector<8x32xf32>
    %24 = tpu.matmul %21, %23, %cst_23 {dimension_numbers = #tpu.dot_dimension_numbers<[1], [0], [0], [1], [0, 0, 1, 1], [], []>} : vector<8x32xf32>, vector<32x32xf32>, vector<8x32xf32> -> vector<8x32xf32>
    %c2_24 = arith.constant 2 : index
    %c0_25 = arith.constant 0 : index
    %c0_26 = arith.constant 0 : index
    %25 = vector.load %arg8[%c2_24, %c0_25, %c0_26] : memref<3x1x32xf32, #tpu.memory_space<vmem>>, vector<1x1x32xf32>
    %26 = vector.shape_cast %25 : vector<1x1x32xf32> to vector<1x32xf32>
    %27 = vector.broadcast %26 : vector<1x32xf32> to vector<8x32xf32>
    %28 = arith.addf %24, %27 : vector<8x32xf32>
    %c0_27 = arith.constant 0 : index
    %c0_28 = arith.constant 0 : index
    %c0_29 = arith.constant 0 : index
    %29 = vector.load %arg5[%c0_27, %c0_28, %c0_29] : memref<1x8x1xf32, #tpu.memory_space<vmem>>, vector<1x8x1xf32>
    %30 = vector.shape_cast %29 : vector<1x8x1xf32> to vector<8x1xf32>
    %c0_30 = arith.constant 0 : index
    %c0_31 = arith.constant 0 : index
    %c0_32 = arith.constant 0 : index
    %31 = vector.load %arg6[%c0_30, %c0_31, %c0_32] : memref<1x1x8xf32, #tpu.memory_space<vmem>>, vector<1x1x8xf32>
    %32 = vector.shape_cast %31 : vector<1x1x8xf32> to vector<1x8xf32>
    %33 = vector.broadcast %30 : vector<8x1xf32> to vector<8x8xf32>
    %34 = vector.broadcast %32 : vector<1x8xf32> to vector<8x8xf32>
    %35 = arith.addf %33, %34 : vector<8x8xf32>
    %36 = tpu.iota {dimensions = array<i32: 0>} : vector<8x8xi32>
    %c8_i32 = arith.constant 8 : i32
    %37 = arith.muli %arg1, %c8_i32 : i32
    %38 = vector.broadcast %37 : i32 to vector<8x8xi32>
    %39 = arith.addi %36, %38 : vector<8x8xi32>
    %40 = tpu.iota {dimensions = array<i32: 1>} : vector<8x8xi32>
    %41 = arith.cmpi sge, %39, %40 : vector<8x8xi32>
    %42 = vector.extract_strided_slice %10 {offsets = [0, 0], sizes = [8, 8], strides = [1, 1]} : vector<8x32xf32> to vector<8x8xf32>
    %43 = vector.extract_strided_slice %19 {offsets = [0, 0], sizes = [8, 8], strides = [1, 1]} : vector<8x32xf32> to vector<8x8xf32>
    %44 = vector.extract_strided_slice %28 {offsets = [0, 0], sizes = [8, 8], strides = [1, 1]} : vector<8x32xf32> to vector<8x8xf32>
    "tpu.trace_start"() <{level = 10 : i32, message = "qd,kd->qk"}> : () -> ()
    %cst_33 = arith.constant dense<0.000000e+00> : vector<8x8xf32>
    %45 = tpu.matmul %42, %43, %cst_33 {dimension_numbers = #tpu.dot_dimension_numbers<[1], [1], [0], [0], [0, 0, 1, 0], [], []>} : vector<8x8xf32>, vector<8x8xf32>, vector<8x8xf32> -> vector<8x8xf32>
    "tpu.trace_stop"() : () -> ()
    %46 = arith.addf %45, %35 : vector<8x8xf32>
    %cst_34 = arith.constant -1.000000e+09 : f32
    %47 = vector.broadcast %cst_34 : f32 to vector<8x8xf32>
    %48 = arith.select %41, %46, %47 : vector<8x8xi1>, vector<8x8xf32>
    %cst_35 = arith.constant dense<0xFF800000> : vector<8xf32>
    %49 = vector.multi_reduction <maximumf>, %48, %cst_35 [1] : vector<8x8xf32> to vector<8xf32>
    %50 = vector.shape_cast %49 : vector<8xf32> to vector<8x1xf32>
    %51 = vector.broadcast %50 : vector<8x1xf32> to vector<8x8xf32>
    %52 = arith.subf %48, %51 : vector<8x8xf32>
    %53 = math.exp %52 : vector<8x8xf32>
    %cst_36 = arith.constant dense<0.000000e+00> : vector<8xf32>
    %54 = vector.multi_reduction <add>, %53, %cst_36 [1] : vector<8x8xf32> to vector<8xf32>
    %55 = vector.shape_cast %54 : vector<8xf32> to vector<8x1xf32>
    %56 = tpu.reciprocal %55 {approx = true} : vector<8x1xf32> -> vector<8x1xf32>
    %57 = vector.broadcast %56 : vector<8x1xf32> to vector<8x8xf32>
    %58 = arith.mulf %53, %57 : vector<8x8xf32>
    %cst_37 = arith.constant dense<0.000000e+00> : vector<8x8xf32>
    %59 = tpu.matmul %58, %44, %cst_37 {dimension_numbers = #tpu.dot_dimension_numbers<[1], [0], [0], [1], [0, 0, 1, 1], [], []>} : vector<8x8xf32>, vector<8x8xf32>, vector<8x8xf32> -> vector<8x8xf32>
    %60 = vector.extract_strided_slice %10 {offsets = [0, 8], sizes = [8, 8], strides = [1, 1]} : vector<8x32xf32> to vector<8x8xf32>
    %61 = vector.extract_strided_slice %19 {offsets = [0, 8], sizes = [8, 8], strides = [1, 1]} : vector<8x32xf32> to vector<8x8xf32>
    %62 = vector.extract_strided_slice %28 {offsets = [0, 8], sizes = [8, 8], strides = [1, 1]} : vector<8x32xf32> to vector<8x8xf32>
    "tpu.trace_start"() <{level = 10 : i32, message = "qd,kd->qk"}> : () -> ()
    %cst_38 = arith.constant dense<0.000000e+00> : vector<8x8xf32>
    %63 = tpu.matmul %60, %61, %cst_38 {dimension_numbers = #tpu.dot_dimension_numbers<[1], [1], [0], [0], [0, 0, 1, 0], [], []>} : vector<8x8xf32>, vector<8x8xf32>, vector<8x8xf32> -> vector<8x8xf32>
    "tpu.trace_stop"() : () -> ()
    %64 = arith.addf %63, %35 : vector<8x8xf32>
    %cst_39 = arith.constant -1.000000e+09 : f32
    %65 = vector.broadcast %cst_39 : f32 to vector<8x8xf32>
    %66 = arith.select %41, %64, %65 : vector<8x8xi1>, vector<8x8xf32>
    %cst_40 = arith.constant dense<0xFF800000> : vector<8xf32>
    %67 = vector.multi_reduction <maximumf>, %66, %cst_40 [1] : vector<8x8xf32> to vector<8xf32>
    %68 = vector.shape_cast %67 : vector<8xf32> to vector<8x1xf32>
    %69 = vector.broadcast %68 : vector<8x1xf32> to vector<8x8xf32>
    %70 = arith.subf %66, %69 : vector<8x8xf32>
    %71 = math.exp %70 : vector<8x8xf32>
    %cst_41 = arith.constant dense<0.000000e+00> : vector<8xf32>
    %72 = vector.multi_reduction <add>, %71, %cst_41 [1] : vector<8x8xf32> to vector<8xf32>
    %73 = vector.shape_cast %72 : vector<8xf32> to vector<8x1xf32>
    %74 = tpu.reciprocal %73 {approx = true} : vector<8x1xf32> -> vector<8x1xf32>
    %75 = vector.broadcast %74 : vector<8x1xf32> to vector<8x8xf32>
    %76 = arith.mulf %71, %75 : vector<8x8xf32>
    %cst_42 = arith.constant dense<0.000000e+00> : vector<8x8xf32>
    %77 = tpu.matmul %76, %62, %cst_42 {dimension_numbers = #tpu.dot_dimension_numbers<[1], [0], [0], [1], [0, 0, 1, 1], [], []>} : vector<8x8xf32>, vector<8x8xf32>, vector<8x8xf32> -> vector<8x8xf32>
    %78 = vector.extract_strided_slice %10 {offsets = [0, 16], sizes = [8, 8], strides = [1, 1]} : vector<8x32xf32> to vector<8x8xf32>
    %79 = vector.extract_strided_slice %19 {offsets = [0, 16], sizes = [8, 8], strides = [1, 1]} : vector<8x32xf32> to vector<8x8xf32>
    %80 = vector.extract_strided_slice %28 {offsets = [0, 16], sizes = [8, 8], strides = [1, 1]} : vector<8x32xf32> to vector<8x8xf32>
    "tpu.trace_start"() <{level = 10 : i32, message = "qd,kd->qk"}> : () -> ()
    %cst_43 = arith.constant dense<0.000000e+00> : vector<8x8xf32>
    %81 = tpu.matmul %78, %79, %cst_43 {dimension_numbers = #tpu.dot_dimension_numbers<[1], [1], [0], [0], [0, 0, 1, 0], [], []>} : vector<8x8xf32>, vector<8x8xf32>, vector<8x8xf32> -> vector<8x8xf32>
    "tpu.trace_stop"() : () -> ()
    %82 = arith.addf %81, %35 : vector<8x8xf32>
    %cst_44 = arith.constant -1.000000e+09 : f32
    %83 = vector.broadcast %cst_44 : f32 to vector<8x8xf32>
    %84 = arith.select %41, %82, %83 : vector<8x8xi1>, vector<8x8xf32>
    %cst_45 = arith.constant dense<0xFF800000> : vector<8xf32>
    %85 = vector.multi_reduction <maximumf>, %84, %cst_45 [1] : vector<8x8xf32> to vector<8xf32>
    %86 = vector.shape_cast %85 : vector<8xf32> to vector<8x1xf32>
    %87 = vector.broadcast %86 : vector<8x1xf32> to vector<8x8xf32>
    %88 = arith.subf %84, %87 : vector<8x8xf32>
    %89 = math.exp %88 : vector<8x8xf32>
    %cst_46 = arith.constant dense<0.000000e+00> : vector<8xf32>
    %90 = vector.multi_reduction <add>, %89, %cst_46 [1] : vector<8x8xf32> to vector<8xf32>
    %91 = vector.shape_cast %90 : vector<8xf32> to vector<8x1xf32>
    %92 = tpu.reciprocal %91 {approx = true} : vector<8x1xf32> -> vector<8x1xf32>
    %93 = vector.broadcast %92 : vector<8x1xf32> to vector<8x8xf32>
    %94 = arith.mulf %89, %93 : vector<8x8xf32>
    %cst_47 = arith.constant dense<0.000000e+00> : vector<8x8xf32>
    %95 = tpu.matmul %94, %80, %cst_47 {dimension_numbers = #tpu.dot_dimension_numbers<[1], [0], [0], [1], [0, 0, 1, 1], [], []>} : vector<8x8xf32>, vector<8x8xf32>, vector<8x8xf32> -> vector<8x8xf32>
    %96 = vector.extract_strided_slice %10 {offsets = [0, 24], sizes = [8, 8], strides = [1, 1]} : vector<8x32xf32> to vector<8x8xf32>
    %97 = vector.extract_strided_slice %19 {offsets = [0, 24], sizes = [8, 8], strides = [1, 1]} : vector<8x32xf32> to vector<8x8xf32>
    %98 = vector.extract_strided_slice %28 {offsets = [0, 24], sizes = [8, 8], strides = [1, 1]} : vector<8x32xf32> to vector<8x8xf32>
    "tpu.trace_start"() <{level = 10 : i32, message = "qd,kd->qk"}> : () -> ()
    %cst_48 = arith.constant dense<0.000000e+00> : vector<8x8xf32>
    %99 = tpu.matmul %96, %97, %cst_48 {dimension_numbers = #tpu.dot_dimension_numbers<[1], [1], [0], [0], [0, 0, 1, 0], [], []>} : vector<8x8xf32>, vector<8x8xf32>, vector<8x8xf32> -> vector<8x8xf32>
    "tpu.trace_stop"() : () -> ()
    %100 = arith.addf %99, %35 : vector<8x8xf32>
    %cst_49 = arith.constant -1.000000e+09 : f32
    %101 = vector.broadcast %cst_49 : f32 to vector<8x8xf32>
    %102 = arith.select %41, %100, %101 : vector<8x8xi1>, vector<8x8xf32>
    %cst_50 = arith.constant dense<0xFF800000> : vector<8xf32>
    %103 = vector.multi_reduction <maximumf>, %102, %cst_50 [1] : vector<8x8xf32> to vector<8xf32>
    %104 = vector.shape_cast %103 : vector<8xf32> to vector<8x1xf32>
    %105 = vector.broadcast %104 : vector<8x1xf32> to vector<8x8xf32>
    %106 = arith.subf %102, %105 : vector<8x8xf32>
    %107 = math.exp %106 : vector<8x8xf32>
    %cst_51 = arith.constant dense<0.000000e+00> : vector<8xf32>
    %108 = vector.multi_reduction <add>, %107, %cst_51 [1] : vector<8x8xf32> to vector<8xf32>
    %109 = vector.shape_cast %108 : vector<8xf32> to vector<8x1xf32>
    %110 = tpu.reciprocal %109 {approx = true} : vector<8x1xf32> -> vector<8x1xf32>
    %111 = vector.broadcast %110 : vector<8x1xf32> to vector<8x8xf32>
    %112 = arith.mulf %107, %111 : vector<8x8xf32>
    %cst_52 = arith.constant dense<0.000000e+00> : vector<8x8xf32>
    %113 = tpu.matmul %112, %98, %cst_52 {dimension_numbers = #tpu.dot_dimension_numbers<[1], [0], [0], [1], [0, 0, 1, 1], [], []>} : vector<8x8xf32>, vector<8x8xf32>, vector<8x8xf32> -> vector<8x8xf32>
    %114 = tpu.concatenate %59, %77, %95, %113 in 1 : vector<8x8xf32>, vector<8x8xf32>, vector<8x8xf32>, vector<8x8xf32> -> vector<8x32xf32>
    %c0_53 = arith.constant 0 : index
    %c0_54 = arith.constant 0 : index
    %115 = vector.load %arg9[%c0_53, %c0_54] : memref<32x32xf32, #tpu.memory_space<vmem>>, vector<32x32xf32>
    %cst_55 = arith.constant dense<0.000000e+00> : vector<8x32xf32>
    %116 = tpu.matmul %114, %115, %cst_55 {dimension_numbers = #tpu.dot_dimension_numbers<[1], [0], [0], [1], [0, 0, 1, 1], [], []>} : vector<8x32xf32>, vector<32x32xf32>, vector<8x32xf32> -> vector<8x32xf32>
    %c0_56 = arith.constant 0 : index
    %c0_57 = arith.constant 0 : index
    %117 = vector.load %arg10[%c0_56, %c0_57] : memref<1x32xf32, #tpu.memory_space<vmem>>, vector<1x32xf32>
    %118 = vector.broadcast %117 : vector<1x32xf32> to vector<8x32xf32>
    %119 = arith.addf %116, %118 : vector<8x32xf32>
    %c0_58 = arith.constant 0 : index
    %c0_59 = arith.constant 0 : index
    %c0_60 = arith.constant 0 : index
    %120 = vector.load %arg11[%c0_58, %c0_59, %c0_60] : memref<1x8x32xf32, #tpu.memory_space<vmem>>, vector<1x8x32xf32>
    %121 = vector.shape_cast %120 : vector<1x8x32xf32> to vector<8x32xf32>
    %122 = vector.shape_cast %119 : vector<8x32xf32> to vector<1x8x32xf32>
    tpu.vector_store %arg11[%c0_58, %c0_59, %c0_60], %122 {strides = array<i32>} : memref<1x8x32xf32, #tpu.memory_space<vmem>>, vector<1x8x32xf32>,
    return
  }
  func.func @transform_0(%arg0: i32, %arg1: i32) -> (i32, i32, i32) {
    %c0_i32 = arith.constant 0 : i32
    %c0_i32_0 = arith.constant 0 : i32
    return %arg0, %arg1, %c0_i32 : i32, i32, i32
  }
  func.func @transform_1(%arg0: i32, %arg1: i32) -> (i32, i32, i32) {
    %c0_i32 = arith.constant 0 : i32
    %c0_i32_0 = arith.constant 0 : i32
    %c0_i32_1 = arith.constant 0 : i32
    return %arg0, %c0_i32, %c0_i32_0 : i32, i32, i32
  }
  func.func @transform_2(%arg0: i32, %arg1: i32) -> (i32, i32, i32) {
    %c0_i32 = arith.constant 0 : i32
    %c0_i32_0 = arith.constant 0 : i32
    %c0_i32_1 = arith.constant 0 : i32
    return %arg0, %c0_i32, %c0_i32_0 : i32, i32, i32
  }
  func.func @transform_3(%arg0: i32, %arg1: i32) -> (i32, i32, i32) {
    %c0_i32 = arith.constant 0 : i32
    %c0_i32_0 = arith.constant 0 : i32
    return %arg0, %arg1, %c0_i32 : i32, i32, i32
  }
  func.func @transform_4(%arg0: i32, %arg1: i32) -> (i32, i32, i32) {
    %c0_i32 = arith.constant 0 : i32
    %c0_i32_0 = arith.constant 0 : i32
    %c0_i32_1 = arith.constant 0 : i32
    return %arg0, %c0_i32, %c0_i32_0 : i32, i32, i32
  }
  func.func @transform_5(%arg0: i32, %arg1: i32) -> (i32, i32, i32) {
    %c0_i32 = arith.constant 0 : i32
    %c0_i32_0 = arith.constant 0 : i32
    %c0_i32_1 = arith.constant 0 : i32
    %c0_i32_2 = arith.constant 0 : i32
    return %c0_i32, %c0_i32_0, %c0_i32_1 : i32, i32, i32
  }
  func.func @transform_6(%arg0: i32, %arg1: i32) -> (i32, i32, i32) {
    %c0_i32 = arith.constant 0 : i32
    %c0_i32_0 = arith.constant 0 : i32
    %c0_i32_1 = arith.constant 0 : i32
    %c0_i32_2 = arith.constant 0 : i32
    return %c0_i32, %c0_i32_0, %c0_i32_1 : i32, i32, i32
  }
  func.func @transform_7(%arg0: i32, %arg1: i32) -> (i32, i32) {
    %c0_i32 = arith.constant 0 : i32
    %c0_i32_0 = arith.constant 0 : i32
    %c0_i32_1 = arith.constant 0 : i32
    return %c0_i32, %c0_i32_0 : i32, i32
  }
  func.func @transform_8(%arg0: i32, %arg1: i32) -> (i32, i32) {
    %c0_i32 = arith.constant 0 : i32
    %c0_i32_0 = arith.constant 0 : i32
    %c0_i32_1 = arith.constant 0 : i32
    return %c0_i32, %c0_i32_0 : i32, i32
  }
  func.func @transform_9(%arg0: i32, %arg1: i32) -> (i32, i32, i32) {
    %c0_i32 = arith.constant 0 : i32
    %c0_i32_0 = arith.constant 0 : i32
    return %arg0, %arg1, %c0_i32 : i32, i32, i32
  }
}

</mosaic_0001>

<bundles_post_ra>
// kernel: tpu_custom_call.1
= control target key start
LH: loop header
LB: loop body
LE: loop exit
PB: predicated region body
PF: predicated region fallthrough
CT: control target
= control target key end

     0   :  { %s1788_s0 = inlined_call_operand.vmem [shape: f32[2,8,32], index: 0, kind: input, shape index: {}]   ;;  %s1789_s1 = inlined_call_operand.hbm [shape: f32[2,8,32], index: 1, kind: input, shape index: {}]   ;;  %s1790_s2 = inlined_call_operand.hbm [shape: f32[2,8,32], index: 2, kind: input, shape index: {}]   ;;  %s1791_s3 = inlined_call_operand.vmem [shape: f32[2,8,1], index: 3, kind: input, shape index: {}]   ;;  %s1792_s4 = inlined_call_operand.vmem [shape: f32[2,1,8], index: 4, kind: input, shape index: {}]   ;;  %s1793_s5 = inlined_call_operand.hbm [shape: f32[3,32,32], index: 5, kind: input, shape index: {}]   ;;  %s1794_s6 = inlined_call_operand.vmem [shape: f32[3,1,32], index: 6, kind: input, shape index: {}]   ;;  %s1795_s7 = inlined_call_operand.hbm [shape: f32[32,32], index: 7, kind: input, shape index: {}]   ;;  %s1796_s8 = inlined_call_operand.vmem [shape: f32[1,32], index: 8, kind: input, shape index: {}]   ;;  %s1797_s9 = inlined_call_operand.hbm [shape: f32[2,8,32], index: 9, kind: output, shape index: {}]  }
   0x1   :  { %1805 = sst [smem:[#allocation23_spill]] %s1793_s5 }
   0x2   :  { %1806 = sst [smem:[#allocation24_spill]] %s1795_s7 }
   0x3   :  { %1807 = sst [smem:[#allocation25_spill]] %s1796_s8 }
   0x4   :  { %14 = vsyncpa [#allocation3], 0 }
   0x5   :  { %16 = vsyncpa [#allocation3 + $0x1], 0 }
   0x6   :  { %17 = vsyncpa [#allocation6], 0 }
   0x7   :  { %19 = vsyncpa [#allocation6 + $0x1], 0 }
   0x8   :  { %20 = vsyncpa [#allocation9], 0 }
   0x9   :  { %21 = vsyncpa [#allocation4], 0 }
   0xa   :  { %23 = vsyncpa [#allocation4 + $0x1], 0  ;;  %s1550_s30 = smov 0   ;;  %s1552_s10 = smov 0  }
   0xb   :  { %s1554_s11 = smov 0   ;;  %s1556_s12 = smov 0  }
   0xc   :  { %s1558_s13 = smov 0   ;;  %s1560_s14 = smov 0  }
   0xd LB: > { %1808 = sst [smem:[#allocation16_spill]] %s1467_s30  ;;  %s1581_s15 = sadd.s32 4294967295, %s1487_s14   ;;  %s1487_s14 = sphi %s1560_s14, %s29_s14   ;;  %s1483_s13 = sphi %s1558_s13, %s1829_s13   ;;  %s1479_s12 = sphi %s1556_s12, %s1828_s12   ;;  %s1475_s11 = sphi %s1554_s11, %s1827_s11   ;;  %s1471_s10 = sphi %s1552_s10, %s1831_s10   ;;  %s1467_s30 = sphi %s1550_s30, %s1830_s30  }
   0xe   : > { %1809 = sst [smem:[#allocation17_spill]] %s1475_s11  ;;  %p1116_p0 = scmp.ge.s32.totalorder %s1487_s14, 1 }
   0xf   : > { %1810 = sst [smem:[#allocation18_spill]] %s1483_s13  ;;  %p90_p1 = scmp.eq.s32.totalorder %s1581_s15, 0 }
  0x10   : > { %p292_p2 = scmp.lt.s32.totalorder %s1487_s14, 3  ;;  %s1811_s5 = sld [smem:[#allocation23_spill]] }
  0x11   : > { %s1489_s20 = smov [#allocation7]   ;;  %p1119_p6 = scmp.ge.s32.totalorder %s1487_s14, 2 }
  0x12   : > { %p1589_p3 = pnand %p1116_p0, %p292_p2  ;;  %s305_s21 = sshll.u32 %s1489_s20, 4  ;;  %s306_s21 = int_to_ptr.vmem [resolvable:$true] %s305_s21 }
  0x13   : > { %s1813_s7 = sld [smem:[#allocation24_spill]]  ;;  %s1490_s25 = smov 128  }
  0x14   : > { %p1168_p4 = pneg %p1589_p3  ;;  %s1491_s26 = smov 8  }
  0x15   : > { %s1492_s27 = smov [#allocation8]   ;;  %s1115_s29 = sadd.s32 4294967294, %s1487_s14  }
  0x16   : > { %s303_s18 = sshll.u32 %s1811_s5, 4  ;;  %p1169_p5 = pnand %p1168_p4, %p90_p1  ;;  %s304_s18 = int_to_ptr.hbm [resolvable:$true] %s303_s18 }
  0x17   : > { %s322_s28 = sshll.u32 %s1492_s27, 4  ;;  %s41_s16 = sadd.s32 1, %s1483_s13  ;;  %s323_s28 = int_to_ptr.vmem [resolvable:$true] %s322_s28 }
  0x18   : > { %1171 = dma.hbm_to_vmem [thread:$0]  (!%p1169_p5), %s304_s18, 1536, %s306_s21, [#allocation6], %s1490_s25, %s1490_s25, %s1491_s26  }
  0x19   : > { %s320_s24 = sshll.u32 %s1813_s7, 4  ;;  %p43_p7 = scmp.ge.s32.totalorder %s41_s16, 2  ;;  %s321_s24 = int_to_ptr.hbm [resolvable:$true] %s320_s24 }
  0x1a   : > { %1174 = dma.hbm_to_vmem [thread:$0]  (!%p1169_p5), %s321_s24, 512, %s323_s28, [#allocation9], %s1490_s25, %s1490_s25, %s1491_s26  }
  0x1b   : > { %s76_s17 = sadd.s32 1, %s1475_s11  ;;  %p83_p8 = scmp.ne.s32.totalorder %s1475_s11, %s1471_s10 }
  0x1c   : > { %p84_p9 = scmp.eq.s32.totalorder %s1487_s14, 0  ;;  %s1833_s16 = smov (%p43_p7, %s41_s16), 0 }
  0x1d   : > { %1814 = sst [smem:[#allocation19_spill]] %s1833_s16  ;;  %p89_p11 = scmp.ne.s32.totalorder %s1471_s10, %s1467_s30 }
  0x1e   : > { %p1609_p10 = por %p84_p9, %p83_p8  ;;  %s73_s20 = ssub.s32 %s1483_s13, %s1833_s16 }
  0x1f   : > { %p279_p12 = scmp.eq.s32.totalorder %s1581_s15, 1  ;;  %p74_p13 = scmp.eq.s32.totalorder %s73_s20, 0 }
  0x20   : > { %p1620_p0 = por %p90_p1, %p89_p11  ;;  %p285_p4 = scmp.eq.s32.totalorder %s1115_s29, 1 }
  0x21   : > { %p1624_p2 = por %p279_p12, %p83_p8  ;;  %p1188_p7 = scmp.lt.s32.totalorder %s1487_s14, 2 }
  0x22   : > { %s1629_s23 = scalar_select %p74_p13, %s1475_s11, %s76_s17  }
  0x23   : > { %s1817_s22 = scalar_select %p1624_p2, 1, 0 }
  0x24   : > { %1819 = sst [smem:[#allocation21_spill]] %s1629_s23  ;;  %p1631_p5 = por %p285_p4, %p89_p11 }
  0x25   : > { %1818 = sst [smem:[#allocation20_spill]] %s1817_s22  ;;  %s349_s25 = sand.u32 1, %s1475_s11  }
  0x26   : > { %s1820_s24 = scalar_select %p1631_p5, 1, 0 }
  0x27   : > { %s1121_s26 = sshll.u32 %s1483_s13, 3  ;;  %s1120_s27 = sshll.u32 %s349_s25, 3 }
  0x28   : > { %1821 = sst [smem:[#allocation22_spill]] %s1820_s24  ;;  %s357_s5 = scalar_lea.hbm %s1789_s1, %s1121_s26 }
  0x29   : > { %s359_s7 = sshll.u32 %s357_s5, 4  ;;  %s353_s16 = scalar_lea.vmem [#allocation2], %s1120_s27  ;;  %s360_s7 = int_to_ptr.hbm [resolvable:$true] %s359_s7 }
  0x2a   : > { %s361_s30 = sshll.u32 %s353_s16, 4  ;;  %p1176_p8 = pnand %p1188_p7, %p1609_p10  ;;  %s362_s30 = int_to_ptr.vmem [resolvable:$true] %s361_s30 }
  0x2b   : > { %s376_s23 = scalar_lea.hbm %s1790_s2, %s1121_s26  ;;  %s368_s24 = sand.u32 1, %s1487_s14  }
  0x2c   : > { %s350_s8 = scalar_lea.sflag [#allocation3], %s349_s25  ;;  %s378_s13 = sshll.u32 %s376_s23, 4  ;;  %s379_s13 = int_to_ptr.hbm [resolvable:$true] %s378_s13 }
  0x2d   : > { %1178 = dma.hbm_to_vmem [thread:$0]  (!%p1176_p8), %s360_s7, 128, %s362_s30, %s350_s8  }
  0x2e   : > { %s372_s11 = scalar_lea.vmem [#allocation5], %s1120_s27  ;;  %s369_s28 = scalar_lea.sflag [#allocation6], %s368_s24 }
  0x2f   : > { %s380_s22 = sshll.u32 %s372_s11, 4  ;;  %405 = sbr.rel (%p1589_p3) target bundleno = 1111 (0x457), region = 56  ;;  %s381_s22 = int_to_ptr.vmem [resolvable:$true] %s380_s22 }
  0x30   : > { %1181 = dma.hbm_to_vmem [thread:$0]  (!%p1176_p8), %s379_s13, 128, %s381_s22, %s369_s28  }
  0x31   : > { %s1650_s5 = sand.u32 (!%p1589_p3), 1, %s1471_s10  }
  0x32   : > { %s1653_s16 = sshll.u32 (!%p1589_p3), %s1650_s5, 3  ;;  %s408_s7 = scalar_lea.sflag (!%p1589_p3), [#allocation3], %s1650_s5 }
  0x33   : > { %s411_s8 = scalar_lea.vmem (!%p1589_p3), [#allocation2], %s1653_s16 }
  0x34   : > { %1446 = dma.done.wait (%p1620_p0), %s408_s7, 128  }
  0x35   : > { %1448 = vsyncadd (%p1620_p0), %s408_s7, 4294967168  ;;  %s417_s30 = sand.u32 1, %s1581_s15   ;;  %s421_s13 = scalar_lea.vmem [#allocation5], %s1653_s16 }
  0x36   : > { %s418_s11 = scalar_lea.sflag [#allocation6], %s417_s30 }
  0x37   : > { %1450 = dma.done.wait (%p1620_p0), %s418_s11, 128  }
  0x38   : > { %1452 = vsyncadd (%p1620_p0), %s418_s11, 4294967168 }
  0x39   : > { %1454 = dma.done.wait (%p90_p1), [#allocation6], 1536  }
  0x3a   : > { %1456 = vsyncadd (%p90_p1), [#allocation6], 4294965760 }
  0x3b   : > { %1458 = dma.done.wait (%p90_p1), [#allocation9], 512  }
  0x3c   : > { %1460 = vsyncadd (%p90_p1), [#allocation9], 4294966784  ;;  %p489_p3 = scmp.lt.s32.totalorder %s1479_s12, 1  ;;  %v545_v0 = vld [vmem:[#allocation7 + $0x38] sm:$0xff]  ;;  %v544_v2 = vld [vmem:[#allocation7 + $0x30] sm:$0xff]  ;;  %vm515_vm0 = vcmask 261120   ;;  %v619_v29 = vlaneseq }
  0x3d   : > { %v510_v1 = vld [vmem:[#allocation7 + $0x18] sm:$0xff]  ;;  %566 = vmatpush.msra.mxu1 %v545_v0  ;;  %v509_v3 = vld [vmem:[#allocation7 + $0x10] sm:$0xff]  ;;  %v543_v4 = vld [vmem:[#allocation7 + $0x28] sm:$0xff]  ;;  %v1493_v10 = vmov 0   ;;  %vm627_vm1 = vcmask 64512   ;;  %s1494_s27 = smov 104  }
  0x3e   : > { %s1677_s19 = scalar_select %p489_p3, %s1479_s12, 1  ;;  %531 = vmatpush.msra.mxu0 %v510_v1  ;;  %v508_v5 = vld [vmem:[#allocation7 + $0x8] sm:$0xff]  ;;  %v542_v6 = vld [vmem:[#allocation7 + $0x20] sm:$0xff]  ;;  %1251 = vset.pattern.permute.xlu0 %v1493_v10  ;;  %v579_v19 = vld [vmem:[#allocation7 + $0x58] sm:$0xff]  ;;  %v620_v33 = vshrl.u32 %v619_v29, 7  ;;  %v625_v34 = vand.u32 127, %v619_v29 }
  0x3f   : > { %567 = vmatpush.msra.mxu1 %v544_v2  ;;  %v507_v7 = vld [vmem:[#allocation7] sm:$0xff]  ;;  %s1495_s20 = smov 120   ;;  %s1496_s29 = smov 112   ;;  %v578_v20 = vld [vmem:[#allocation7 + $0x50] sm:$0xff]  ;;  %600 = vmatpush.msra.mxu2 %v579_v19  ;;  %v577_v21 = vld [vmem:[#allocation7 + $0x48] sm:$0xff]  ;;  %vm901_vm3 = vcmask 130048  }
  0x40   : > { %s1130_s18 = sshll.u32 %s1677_s19, 3  ;;  %532 = vmatpush.msra.mxu0 %v509_v3  ;;  %v540_v8 = vld [vmem:[%s411_s8] sm:$0xff]  ;;  %s505_s7 = scalar_lea.vmem %s1792_s4, %s1677_s19  ;;  %v574_v23 = vld [vmem:[%s421_s13] sm:$0xff]  ;;  %vm626_vm2 = vcmp.ge.s32.totalorder %v620_v33, %v625_v34  ;;  %vm903_vm4 = vcmask 195584  }
  0x41   : > { %s495_s22 = scalar_lea.vmem %s1788_s0, %s1130_s18  ;;  %568 = vmatpush.msra.mxu1 %v543_v4  ;;  %v1252_v11 = vld [vmem:[%s1794_s6 + $0x1] ss:$0 sm:$0xff]  ;;  %v1253_v12 = vld [vmem:[%s1794_s6] ss:$0 sm:$0xff]  ;;  %s502_s11 = scalar_lea.vmem %s1791_s3, %s1130_s18  ;;  %601 = vmatpush.msra.mxu2 %v578_v20  ;;  %v1255_v40 = vld [vmem:[%s1794_s6 + $0x2] ss:$0 sm:$0xff] }
  0x42   : > { %533 = vmatpush.msra.mxu0 %v508_v5  ;;  %v506_v9 = vld [vmem:[%s495_s22] sm:$0xff]  ;;  %s1497_s18 = smov 8   ;;  %s1498_s15 = smov 24  }
  0x43   : > { %569 = vmatpush.msra.mxu1 %v542_v6  ;;  %v608_v18 = vld [vmem:[%s502_s11] sm:$0xff]  ;;  %602 = vmatpush.msra.mxu2 %v577_v21  ;;  %s1499_s21 = smov 16   ;;  %s1151_s22 = sshll.u32 %s1479_s12, 3 }
  0x44   : > { %534 = vmatpush.msra.mxu0 %v507_v7  ;;  %1134 = vmatmul.msk.f32.vlgmr.msra.gmra.mxu1 %vm515_vm0, %v540_v8  ;;  %v576_v22 = vld [vmem:[#allocation7 + $0x40] sm:$0xff]  ;;  %s949_s26 = scalar_lea.hbm %s1797_s9, %s1151_s22  ;;  %s488_s17 = scalar_lea.vmem [#allocation10], %s1653_s16 }
  0x45   : > { %1132 = vmatmul.msk.f32.vlgmr.msra.gmra.mxu0 %vm515_vm0, %v506_v9  ;;  %603 = vmatpush.msra.mxu2 %v576_v22  ;;  %v1254_v30 = vld [vmem:[%s505_s7] ss:$0 sm:$0xff]  ;;  %s951_s28 = sshll.u32 %s488_s17, 4  ;;  %s953_s7 = sshll.u32 %s949_s26, 4  ;;  %s952_s28 = int_to_ptr.vmem [resolvable:$true] %s951_s28  ;;  %s954_s7 = int_to_ptr.hbm [resolvable:$true] %s953_s7 }
  0x46   : > { %1136 = vmatmul.msk.f32.vlgmr.msra.gmra.mxu2 %vm515_vm0, %v574_v23  ;;  %v905_v33 = vld [vmem:[#allocation8] sm:$0xff]  ;;  %s938_s8 = scalar_lea.sflag [#allocation4], %s1650_s5  ;;  %s1407_s12 = sshra.s32 %s954_s7, 4  ;;  %s1408_s12 = int_to_ptr.hbm [resolvable:$true] %s1407_s12 }
  0x47   : > { %s1409_s30 = scalar_lea.hbm %s1408_s12, 8  ;;  %s1413_s16 = scalar_lea.hbm %s1797_s9, 16 }
  0x48   : > { %p1410_p1 = scmp.ne.s32.totalorder %s1408_s12, %s1409_s30  ;;  %p1414_p11 = scmp.lt.s32.totalorder %s1408_s12, %s1797_s9 }
  0x49   : > { %p1415_p12 = scmp.lt.s32.totalorder %s1413_s16, %s1409_s30 }
  0x4a   : > { %p1411_p9 = pnand %p1410_p1, %p1624_p2 }
  0x4b   : > { %p1416_p13 = por %p1415_p12, %p1414_p11 }
  0x4c   : > { %p1412_p10 = pneg %p1411_p9 }
  0x4e   : > { %p1417_p0 = pnand %p1416_p13, %p1412_p10 }
  0xc1   : > { %v571_v13 = vpop.f32.mrf.mxu1 }
  0xc2   : > { %v536_v14 = vpop.f32.mrf.mxu0  ;;  %v572_v15 = vadd.f32 %v1252_v11, %v571_v13 }
  0xc3   : > { %v537_v16 = vadd.f32 %v1253_v12, %v536_v14 }
  0xc4   : > { %824 = vrot.lane.b32.xlu2 %v572_v15, %s1494_s27  ;;  %691 = vrot.lane.b32.xlu1 %v572_v15, %s1495_s20 }
  0xc5   : > { %v539_v17 = vmul.f32 0.35355338, %v537_v16  ;;  %758 = vrot.lane.b32.xlu0 %v572_v15, %s1496_s29  ;;  %1137 = vmatpush.xpose.msk.msra.mxu3 %vm627_vm1, %v572_v15 }
  0xc8   : > { %1138 = vmatmul.msk.f32.vlgmr.msra.gmra.mxu3 %vm627_vm1, %v539_v17 }
  0xc9   : > { %v605_v41 = vpop.f32.mrf.mxu2 }
  0xca   : > { %v606_v42 = vadd.f32 %v1255_v40, %v605_v41 }
  0xcc   : > { %822 = vrot.lane.b32.xlu2 %v539_v17, %s1494_s27  ;;  %689 = vrot.lane.b32.xlu1 %v539_v17, %s1495_s20 }
  0xcd   : > { %756 = vrot.lane.b32.xlu0 %v539_v17, %s1496_s29  ;;  %684 = vmatpush.msrb.mxu3 %v606_v42 }
  0xd5   : > { %612 = vperm.xlu0 %1251, %v608_v18  }
 0x11e   : > { %v825_v25 = vpop.permute.xlu2 %824 }
 0x126   : > { %v823_v31 = vpop.permute.xlu2 %822 }
 0x136   : > { %v692_v24 = vpop.permute.xlu1 %691 }
 0x137   : > { %v759_v26 = vpop.permute.xlu0 %758  ;;  %1140 = vmatpush.xpose.msk.msrb.mxu0 %vm627_vm1, %v692_v24 }
 0x138   : > { %1143 = vmatpush.xpose.msk.msrb.mxu2 %vm627_vm1, %v759_v26 }
 0x13b   : > { %1146 = vmatpush.xpose.msk.msra.mxu0 %vm627_vm1, %v825_v25 }
 0x13e   : > { %v690_v27 = vpop.permute.xlu1 %689 }
 0x13f   : > { %v757_v28 = vpop.permute.xlu0 %756  ;;  %1141 = vmatmul.msk.f32.vlgmr.msrb.gmra.mxu0 %vm627_vm1, %v690_v27 }
 0x140   : > { %1144 = vmatmul.msk.f32.vlgmr.msrb.gmra.mxu2 %vm627_vm1, %v757_v28 }
 0x147   : > { %1147 = vmatmul.msk.f32.vlgmr.msra.gmra.mxu0 %vm627_vm1, %v823_v31  ;;  %v613_v32 = vpop.permute.xlu0 %612  ;;  %v907_v31 = vld [vmem:[#allocation8 + $0x10] sm:$0xff] }
 0x148   : > { %v618_v35 = vadd.f32 %v1254_v30, %v613_v32  ;;  %v908_v30 = vld [vmem:[#allocation8 + $0x18] sm:$0xff]  ;;  %v906_v32 = vld [vmem:[#allocation8 + $0x8] sm:$0xff] }
 0x149   : > { %928 = vmatpush.msra.mxu2 %v908_v30 }
 0x14b   : > { %v651_v36 = vpop.f32.mrf.mxu3  ;;  %929 = vmatpush.msra.mxu2 %v907_v31 }
 0x14c   : > { %v652_v37 = vadd.f32 %v651_v36, %v618_v35 }
 0x14d   : > { %930 = vmatpush.msra.mxu2 %v906_v32 }
 0x14e   : > { %v654_v38 = vsel %vm626_vm2, %v652_v37, -1e+09 }
 0x14f   : > { %v655_v39 = vsel %vm627_vm1, %v654_v38, -inf  ;;  %931 = vmatpush.msra.mxu2 %v905_v33 }
 0x150   : > { %656 = vmax.xlane.f32.xlu1 %v655_v39 }
 0x1bc   : > { %v714_v43 = vpop.f32.mrf.mxu0 }
 0x1bd   : > { %v715_v44 = vadd.f32 %v714_v43, %v618_v35 }
 0x1bf   : > { %v717_v45 = vsel %vm626_vm2, %v715_v44, -1e+09 }
 0x1c0   : > { %v718_v46 = vsel %vm627_vm1, %v717_v45, -inf }
 0x1c1   : > { %719 = vmax.xlane.f32.xlu2 %v718_v46 }
 0x1c3   : > { %v781_v47 = vpop.f32.mrf.mxu2  ;;  %v657_v48 = vpop.xlane.xlu1 %656 }
 0x1c4   : > { %v782_v49 = vadd.f32 %v781_v47, %v618_v35  ;;  %v658_v50 = vsub.f32 %v654_v38, %v657_v48  ;;  %v847_v51 = vpop.f32.mrf.mxu0 }
 0x1c5   : > { %v848_v52 = vadd.f32 %v847_v51, %v618_v35 }
 0x1c6   : > { %v659_v53 = vmul.f32 1.442695, %v658_v50  ;;  %v784_v54 = vsel %vm626_vm2, %v782_v49, -1e+09 }
 0x1c7   : > { %v785_v55 = vsel %vm627_vm1, %v784_v54, -inf  ;;  %v850_v56 = vsel %vm626_vm2, %v848_v52, -1e+09 }
 0x1c8   : > { %1257 = vpow2.f32 %v659_v53  ;;  %786 = vmax.xlane.f32.xlu0 %v785_v55  ;;  %v851_v57 = vsel %vm627_vm1, %v850_v56, -inf }
 0x1c9   : > { %852 = vmax.xlane.f32.xlu2 %v851_v57 }
 0x1ce   : > { %v1258_v58 = vpop.eup %1257 }
 0x1cf   : > { %v661_v59 = vsel %vm627_vm1, %v1258_v58, 0.0 }
 0x1d0   : > { %662 = vadd.xlane.f32.xlu1 %v661_v59 }
 0x1dc   : > { %730 = vrot.lane.b32.xlu0 %v606_v42, %s1495_s20 }
 0x234   : > { %v720_v60 = vpop.xlane.xlu2 %719 }
 0x235   : > { %v721_v61 = vsub.f32 %v717_v45, %v720_v60 }
 0x237   : > { %v722_v62 = vmul.f32 1.442695, %v721_v61 }
 0x239   : > { %1259 = vpow2.f32 %v722_v62 }
 0x23b   : > { %v787_v63 = vpop.xlane.xlu0 %786 }
 0x23c   : > { %v788_v0 = vsub.f32 %v784_v54, %v787_v63  ;;  %v853_v1 = vpop.xlane.xlu2 %852 }
 0x23d   : > { %v854_v2 = vsub.f32 %v850_v56, %v853_v1 }
 0x23e   : > { %v789_v3 = vmul.f32 1.442695, %v788_v0 }
 0x23f   : > { %v1260_v4 = vpop.eup %1259  ;;  %v855_v5 = vmul.f32 1.442695, %v854_v2 }
 0x240   : > { %1261 = vpow2.f32 %v789_v3  ;;  %v724_v6 = vsel %vm627_vm1, %v1260_v4, 0.0 }
 0x241   : > { %1263 = vpow2.f32 %v855_v5  ;;  %725 = vadd.xlane.f32.xlu2 %v724_v6 }
 0x243   : > { %v663_v7 = vpop.xlane.xlu1 %662 }
 0x244   : > { %1265 = vrcp.f32 %v663_v7 }
 0x246   : > { %v1262_v8 = vpop.eup %1261 }
 0x247   : > { %v1264_v9 = vpop.eup %1263  ;;  %v791_v10 = vsel %vm627_vm1, %v1262_v8, 0.0 }
 0x248   : > { %792 = vadd.xlane.f32.xlu1 %v791_v10  ;;  %v857_v11 = vsel %vm627_vm1, %v1264_v9, 0.0 }
 0x249   : > { %858 = vadd.xlane.f32.xlu2 %v857_v11 }
 0x24a   : > { %v1266_v12 = vpop.eup %1265 }
 0x24b   : > { %v665_v13 = vmul.f32 %v1266_v12, %v1258_v58 }
 0x24d   : > { %1139 = vmatmul.msk.f32.vlgmr.msrb.gmra.mxu3 %vm627_vm1, %v665_v13 }
 0x24e   : > { %v731_v14 = vpop.permute.xlu0 %730 }
 0x24f   : > { %751 = vmatpush.msrb.mxu1 %v731_v14 }
 0x261   : > { %796 = vrot.lane.b32.xlu1 %v606_v42, %s1496_s29  ;;  %862 = vrot.lane.b32.xlu2 %v606_v42, %s1494_s27  ;;  %s1823_s29 = sld [smem:[#allocation25_spill]] }
 0x267   : > { %v1256_v40 = vld [vmem:[%s1823_s29] ss:$0 sm:$0xff] }
 0x2b4   : > { %v726_v15 = vpop.xlane.xlu2 %725 }
 0x2b5   : > { %1267 = vrcp.f32 %v726_v15 }
 0x2bb   : > { %v1268_v16 = vpop.eup %1267  ;;  %v793_v22 = vpop.xlane.xlu1 %792 }
 0x2bc   : > { %v859_v17 = vpop.xlane.xlu2 %858  ;;  %v728_v18 = vmul.f32 %v1268_v16, %v1260_v4 }
 0x2bd   : > { %1269 = vrcp.f32 %v859_v17 }
 0x2be   : > { %1142 = vmatmul.msk.f32.vlgmr.msrb.gmra.mxu1 %vm627_vm1, %v728_v18  ;;  %1271 = vrcp.f32 %v793_v22 }
 0x2c3   : > { %v1270_v19 = vpop.eup %1269 }
 0x2c4   : > { %v861_v20 = vmul.f32 %v1270_v19, %v1264_v9  ;;  %v863_v21 = vpop.permute.xlu2 %862  ;;  %v1272_v23 = vpop.eup %1271 }
 0x2c5   : > { %883 = vmatpush.msra.mxu1 %v863_v21  ;;  %v795_v24 = vmul.f32 %v1272_v23, %v1262_v8 }
 0x2c6   : > { %1148 = vmatmul.msk.f32.vlgmr.msra.gmra.mxu1 %vm627_vm1, %v861_v20 }
 0x2d0   : > { %v686_v28 = vpop.f32.mrf.mxu3 }
 0x2d3   : > { %v797_v25 = vpop.permute.xlu1 %796 }
 0x2d4   : > { %817 = vmatpush.msra.mxu3 %v797_v25 }
 0x2d5   : > { %1145 = vmatmul.msk.f32.vlgmr.msra.gmra.mxu3 %vm627_vm1, %v795_v24 }
 0x33b   : > { %v753_v26 = vpop.f32.mrf.mxu1 }
 0x33c   : > { %889 = vrot.lane.b32.xlu0 %v753_v26, %s1497_s18 }
 0x343   : > { %v885_v27 = vpop.f32.mrf.mxu1 }
 0x344   : > { %897 = vrot.lane.b32.xlu0 %v885_v27, %s1498_s15 }
 0x358   : > { %v819_v29 = vpop.f32.mrf.mxu3 }
 0x359   : > { %893 = vrot.lane.b32.xlu1 %v819_v29, %s1499_s21 }
 0x3ae   : > { %v890_v34 = vpop.permute.xlu0 %889 }
 0x3af   : > { %v900_v35 = vsel %vm627_vm1, %v686_v28, %v890_v34 }
 0x3b6   : > { %v898_v37 = vpop.permute.xlu0 %897 }
 0x3cb   : > { %v894_v36 = vpop.permute.xlu1 %893 }
 0x3cc   : > { %v902_v38 = vsel %vm901_vm3, %v900_v35, %v894_v36 }
 0x3cd   : > { %v904_v39 = vsel %vm903_vm4, %v902_v38, %v898_v37 }
 0x3ce   : > { %1149 = vmatmul.msk.f32.vlgmr.msra.gmra.mxu2 %vm515_vm0, %v904_v39 }
 0x451   : > { %v933_v41 = vpop.f32.mrf.mxu2 }
 0x452   : > { %v934_v42 = vadd.f32 %v1256_v40, %v933_v41 }
 0x454   : > { %936 = vst.msk [vmem:[%s488_s17] sm:$0xff] %vm515_vm0, %v934_v42 }
 0x455   : > { %1420 = shalt.err (!%p1417_p0)
}
 0x456   : > { %1166 = dma.vmem_to_hbm [thread:$0]  (%p1624_p2), %s952_s28, 128, %s954_s7, %s938_s8  }
 0x457 PF: > { %s1824_s5 = sld [smem:[#allocation16_spill]]  ;;  %p1183_p4 = pnand %p1119_p6, %p1631_p5 }
 0x459   : > { %p1184_p7 = pneg %p1183_p4 }
 0x45d   : > { %s965_s21 = sand.u32 1, %s1824_s5  }
 0x45e   : > { %s966_s22 = scalar_lea.sflag [#allocation4], %s965_s21 }
 0x45f   : > { %1462 = dma.done.wait (%p1184_p7), %s966_s22, 128  }
 0x460   : > { %1464 = vsyncadd (%p1184_p7), %s966_s22, 4294967168  ;;  %s29_s14 = sadd.s32 1, %s1487_s14   ;;  %s1826_s23 = sld [smem:[#allocation17_spill]] }
 0x461   : > { %p26_p8 = scmp.ge.s32.totalorder %s29_s14, 4   ;;  %s1827_s11 = sld [smem:[#allocation21_spill]] }
 0x462   : > { %s1828_s12 = sld [smem:[#allocation18_spill]]  ;;  %s1830_s30 = smov %s1471_s10 }
 0x463   : > { %s1829_s13 = sld [smem:[#allocation19_spill]]  ;;  %28 = sbr.rel (!%p26_p8) target bundleno = 13 (0xd), region = 135 }
 0x466   : > { %s1831_s10 = smov %s1826_s23 }
 0x468   :  { %972 = vsyncpa [#allocation3], 1 }
 0x469   :  { %974 = vsyncpa [#allocation3 + $0x1], 1 }
 0x46a   :  { %975 = vsyncpa [#allocation6], 1 }
 0x46b   :  { %977 = vsyncpa [#allocation6 + $0x1], 1 }
 0x46c   :  { %978 = vsyncpa [#allocation9], 1 }
 0x46d   :  { %979 = vsyncpa [#allocation4], 1 }
 0x46e   :  { %981 = vsyncpa [#allocation4 + $0x1], 1 }

</bundles_post_ra>
